<compile_context>
chip_gen: v6e
topology: v6e:2x2x1
jax: 0.10.0
libtpu: 0.0.40
codegen_flags: <defaults>
</compile_context>

<pallas_src>
import jax
import jax.numpy as jnp
from jax.experimental import pallas as pl
from jax.experimental.pallas import tpu as pltpu


def _cdiv(a, b):
    return -(-a // b)


def _ceil_to(x, m):
    return _cdiv(x, m) * m


def _spatial_attention_kernel(x_ref, w_ref, b_ref, o_ref):
    # x_ref : (TB, C, TN)  batch rows folded, channels on sublane, spatial on lane
    # w_ref : (C, 1)       1x1-conv weight (f32), resident across the grid
    # b_ref : (1, 1)       bias scalar in SMEM
    # o_ref : (TB, C, TN)  output tile (same dtype as input)
    x = x_ref[...]                                   # (TB, C, TN), input dtype
    w = w_ref[...]                                   # (C, 1), f32

    # 1x1 conv over channels == per-pixel weighted sum over the C sublane rows.
    # Multiply in the input dtype, accumulate the channel reduction in f32.
    xw = x * w.astype(x.dtype)[None, :, :]           # (TB, C, TN)
    logits = jnp.sum(xw.astype(jnp.float32), axis=1, keepdims=True) + b_ref[0, 0]
    att = jax.nn.sigmoid(logits)                     # (TB, 1, TN), f32

    # Gate in the input dtype; att broadcasts over the channel (sublane) axis.
    # NOTE: lanes past HW in a ragged last block hold garbage -- safe only
    # because this line is purely elementwise and the store is masked.
    o_ref[...] = (x * att.astype(x.dtype)).astype(o_ref.dtype)


def _choose_tiles(B, C, HW, itemsize):
    """Pick (TB, TN): MiB-class blocks, VMEM-budget aware, a few grid steps."""
    # Sublane padding of the channel axis in VMEM (f32 -> 8, bf16/fp16 -> 16).
    c_pad = _ceil_to(C, 8 if itemsize >= 4 else 16)
    target_block_bytes = 2 << 20   # ~2 MiB x-block -> ~4 MiB read+write per step
    cap_block_bytes = 4 << 20      # per-buffer cap: 4 double-buffers <= ~16 MiB padded

    # Lane tile: full spatial extent if a single batch row fits the cap,
    # otherwise the largest 128-multiple that does (keeps stores lane-dense).
    if c_pad * _ceil_to(HW, 128) * itemsize <= cap_block_bytes:
        tn = HW
    else:
        tn = (cap_block_bytes // (c_pad * itemsize)) // 128 * 128
        tn = max(128, min(tn, (HW // 128) * 128 if HW >= 128 else HW))

    # Batch tile: fold rows until the block reaches ~target bytes (padded acct).
    row_bytes = c_pad * _ceil_to(tn, 128) * itemsize
    tb = max(1, min(B, target_block_bytes // row_bytes))

    # Keep >= ~8 grid steps when the problem size allows (megacore / v7x 2 TCs).
    max_steps = B * _cdiv(HW, tn)
    while tb > 1 and _cdiv(B, tb) * _cdiv(HW, tn) < min(8, max_steps):
        tb = max(1, tb // 2)
    return tb, tn


@jax.jit
def spatial_attention(x_nchw, weight, bias):
    """x_nchw: (B, C, H, W); weight: (C,) 1x1-conv weight for the single output
    channel; bias: scalar. Returns (B, C, H, W)."""
    B, C, H, W = x_nchw.shape
    HW = H * W
    x3 = x_nchw.reshape(B, C, HW)                    # free reshape, no HBM pass
    itemsize = jnp.dtype(x_nchw.dtype).itemsize

    tb, tn = _choose_tiles(B, C, HW, itemsize)
    grid = (_cdiv(B, tb), _cdiv(HW, tn))             # ragged blocks -> masked writeback

    w2d = weight.reshape(C, 1).astype(jnp.float32)
    b2d = jnp.asarray(bias, jnp.float32).reshape(1, 1)

    cost = pl.CostEstimate(
        flops=3 * B * C * HW,                        # conv mul+add + gating mul
        transcendentals=B * HW,                      # sigmoid
        bytes_accessed=2 * B * C * HW * itemsize + C * 4 + 4,
    )

    out3 = pl.pallas_call(
        _spatial_attention_kernel,
        out_shape=jax.ShapeDtypeStruct((B, C, HW), x_nchw.dtype),
        grid_spec=pltpu.PrefetchScalarGridSpec(
            num_scalar_prefetch=0,
            grid=grid,
            in_specs=[
                pl.BlockSpec((tb, C, tn), lambda b, j: (b, 0, j)),   # x tile
                pl.BlockSpec((C, 1), lambda b, j: (0, 0)),           # weight (resident)
                pl.BlockSpec(memory_space=pltpu.MemorySpace.SMEM),   # bias scalar
            ],
            out_specs=pl.BlockSpec((tb, C, tn), lambda b, j: (b, 0, j)),
        ),
        compiler_params=pltpu.CompilerParams(
            dimension_semantics=("parallel", "parallel"),
            # Raise the scoped VMEM limit so MiB-class double-buffers compile on
            # v5e (16 MiB default) while staying under v7x's 64 MiB physical.
            vmem_limit_bytes=40 * 1024 * 1024,
        ),
        cost_estimate=cost,
    )(x3, w2d, b2d)

    return out3.reshape(B, C, H, W)


if __name__ == "__main__":
    key = jax.random.PRNGKey(0)
    kx, kw, kb = jax.random.split(key, 3)

    B, C, H, W = 2, 4, 16, 16
    x = jax.random.normal(kx, (B, C, H, W), dtype=jnp.float32)
    # Deterministic "Conv2d(C, 1, kernel_size=1)" parameters.
    weight = jax.random.normal(kw, (C,), dtype=jnp.float32) * 0.5
    bias = jax.random.normal(kb, (), dtype=jnp.float32) * 0.1

    out = jax.block_until_ready(spatial_attention(x, weight, bias))

    # Pure-JAX reference (same math as the PyTorch module).
    logits = jnp.einsum("bchw,c->bhw", x, weight) + bias
    ref = x * jax.nn.sigmoid(logits)[:, None, :, :]

    assert out.shape == (B, C, H, W)
    assert jnp.allclose(out, ref, atol=1e-5, rtol=1e-5), "mismatch vs reference"
    print("KERNEL_OK")
</pallas_src>

<mosaic_0001>
module attributes {stable_mosaic.version = 11 : i64} {
  func.func @_spatial_attention_kernel(%arg0: i32, %arg1: i32, %arg2: memref<1x4x256xf32, #tpu.memory_space<vmem>>, %arg3: memref<4x1xf32, #tpu.memory_space<vmem>>, %arg4: memref<1x1xf32, #tpu.memory_space<smem>>, %arg5: memref<1x4x256xf32, #tpu.memory_space<vmem>>) attributes {dimension_semantics = [#tpu.dimension_semantics<parallel>, #tpu.dimension_semantics<parallel>], iteration_bounds = array<i64: 2, 1>, scalar_prefetch = 0 : i64, scratch_operands = 0 : i64, tpu.core_type = #tpu.core_type<tc>, window_params = [{transform_indices = @transform_0, window_bounds = array<i64: 1, 4, 256>}, {pipeline_mode = #tpu.pipeline_mode<synchronous>, transform_indices = @transform_1, window_bounds = array<i64: 4, 1>}, {transform_indices = @transform_2, window_bounds = array<i64: 1, 1>}, {transform_indices = @transform_3, window_bounds = array<i64: 1, 4, 256>}]} {
    %c0 = arith.constant 0 : index
    %c0_0 = arith.constant 0 : index
    %c0_1 = arith.constant 0 : index
    %0 = vector.load %arg2[%c0, %c0_0, %c0_1] : memref<1x4x256xf32, #tpu.memory_space<vmem>>, vector<1x4x256xf32>
    %c0_2 = arith.constant 0 : index
    %c0_3 = arith.constant 0 : index
    %1 = vector.load %arg3[%c0_2, %c0_3] : memref<4x1xf32, #tpu.memory_space<vmem>>, vector<4x1xf32>
    %2 = vector.shape_cast %1 : vector<4x1xf32> to vector<1x4x1xf32>
    %3 = vector.broadcast %2 : vector<1x4x1xf32> to vector<1x4x256xf32>
    %4 = arith.mulf %0, %3 : vector<1x4x256xf32>
    %cst = arith.constant dense<0.000000e+00> : vector<1x256xf32>
    %5 = vector.multi_reduction <add>, %4, %cst [1] : vector<1x4x256xf32> to vector<1x256xf32>
    %6 = vector.shape_cast %5 : vector<1x256xf32> to vector<1x1x256xf32>
    %c0_4 = arith.constant 0 : index
    %c0_5 = arith.constant 0 : index
    %7 = memref.load %arg4[%c0_4, %c0_5] : memref<1x1xf32, #tpu.memory_space<smem>>
    %8 = vector.broadcast %7 : f32 to vector<1x1x256xf32>
    %9 = arith.addf %6, %8 : vector<1x1x256xf32>
    %10 = arith.negf %9 : vector<1x1x256xf32>
    %11 = math.exp %10 : vector<1x1x256xf32>
    %cst_6 = arith.constant 1.000000e+00 : f32
    %12 = vector.broadcast %cst_6 : f32 to vector<1x1x256xf32>
    %13 = arith.addf %12, %11 : vector<1x1x256xf32>
    %14 = arith.divf %12, %13 : vector<1x1x256xf32>
    %15 = vector.broadcast %14 : vector<1x1x256xf32> to vector<1x4x256xf32>
    %16 = arith.mulf %0, %15 : vector<1x4x256xf32>
    %c0_7 = arith.constant 0 : index
    %c0_8 = arith.constant 0 : index
    %c0_9 = arith.constant 0 : index
    %17 = vector.load %arg5[%c0_7, %c0_8, %c0_9] : memref<1x4x256xf32, #tpu.memory_space<vmem>>, vector<1x4x256xf32>
    tpu.vector_store %arg5[%c0_7, %c0_8, %c0_9], %16 {strides = array<i32>} : memref<1x4x256xf32, #tpu.memory_space<vmem>>, vector<1x4x256xf32>,
    return
  }
  func.func @transform_0(%arg0: i32, %arg1: i32) -> (i32, i32, i32) {
    %c0_i32 = arith.constant 0 : i32
    %c0_i32_0 = arith.constant 0 : i32
    return %arg0, %c0_i32, %arg1 : i32, i32, i32
  }
  func.func @transform_1(%arg0: i32, %arg1: i32) -> (i32, i32) {
    %c0_i32 = arith.constant 0 : i32
    %c0_i32_0 = arith.constant 0 : i32
    %c0_i32_1 = arith.constant 0 : i32
    return %c0_i32, %c0_i32_0 : i32, i32
  }
  func.func @transform_2(%arg0: i32, %arg1: i32) -> (i32, i32) {
    %c0_i32 = arith.constant 0 : i32
    %c0_i32_0 = arith.constant 0 : i32
    %c0_i32_1 = arith.constant 0 : i32
    return %c0_i32, %c0_i32_0 : i32, i32
  }
  func.func @transform_3(%arg0: i32, %arg1: i32) -> (i32, i32, i32) {
    %c0_i32 = arith.constant 0 : i32
    %c0_i32_0 = arith.constant 0 : i32
    return %arg0, %c0_i32, %arg1 : i32, i32, i32
  }
}

</mosaic_0001>

<bundles_post_ra>
// kernel: spatial_attention.1
= control target key start
LH: loop header
LB: loop body
LE: loop exit
PB: predicated region body
PF: predicated region fallthrough
CT: control target
= control target key end

     0   :  { %s452_s14 = smov 0   ;;  %s454_s15 = smov 0   ;;  %s495_s0 = inlined_call_operand.vmem [shape: f32[2,4,256], index: 0, kind: input, shape index: {}]   ;;  %s496_s1 = inlined_call_operand.vmem [shape: f32[4,1], index: 1, kind: input, shape index: {}]   ;;  %s497_s2 = inlined_call_operand.<no memory space> [shape: f32[1,1], index: 2, kind: input, shape index: {}]   ;;  %s498_s3 = inlined_call_operand.vmem [shape: f32[2,4,256], index: 3, kind: output, shape index: {}]  }
   0x1   :  { %8 = sst [smem:[#allocation2]] %s497_s2  ;;  %s456_s16 = smov 0  }
   0x2 LB: > { %s26_s2 = sadd.s32 1, %s421_s15  ;;  %p357_p0 = scmp.ge.s32.totalorder %s425_s16, 1  ;;  %s425_s16 = sphi %s456_s16, %s14_s16   ;;  %s421_s15 = sphi %s454_s15, %s500_s15   ;;  %s417_s14 = sphi %s452_s14, %s499_s14  }
   0x3   : > { %p28_p1 = scmp.ge.s32.totalorder %s26_s2, 2  ;;  %p159_p2 = scmp.lt.s32.totalorder %s425_s16, 3 }
   0x5   : > { %s502_s2 = smov (%p28_p1, %s26_s2), 0  ;;  %p160_p3 = pnand %p357_p0, %p159_p2 }
   0x6   : > { %p192_p4 = scmp.lt.s32.totalorder (!%p160_p3), %s417_s14, 1  ;;  %s244_s23 = sld [smem:[#allocation2]] (!%p160_p3) }
   0x7   : > { %163 = sbr.rel (%p160_p3) target bundleno = 196 (0xc4), region = 32 }
   0xc   : > { %v212_v0 = vld [vmem:[%s496_s1] sm:$0xf]  ;;  %v427_v1 = vmov 0   ;;  %v428_v2 = vmov 839922192   ;;  %v220_v4 = vlaneseq  ;;  %s504_s14 = smov (!%p192_p4, %s417_s14), 1  ;;  %v245_v24 = vstv %s244_s23 }
   0xd   : > { %394 = vset.pattern.permute.xlu0 %v427_v1  ;;  %v218_v3 = vunpack.c.l.s4 %v428_v2  ;;  %s366_s19 = sshll.u32 %s504_s14, 3  ;;  %vm229_vm0 = vcmask 1043456  }
   0xe   : > { %215 = vperm.xlu0 %394, %v212_v0   ;;  %v221_v6 = vshrl.u32 %v220_v4, 7  ;;  %s199_s22 = scalar_lea.vmem %s495_s0, %s366_s19  ;;  %s209_s26 = scalar_lea.vmem %s498_s3, %s366_s19 }
   0xf   : > { %v219_v5 = vunpack.c.0.s8 %v218_v3  ;;  %v211_v9 = vld [vmem:[%s199_s22] sm:$0xff] }
  0x11   : > { %v222_v7 = vsub.s32 %v219_v5, %v221_v6 }
  0x89   : > { %v216_v8 = vpop.permute.xlu0 %215 }
  0x8a   : > { %v223_v10 = vrot.slane %v216_v8, %v222_v7 }
  0x8c   : > { %v225_v11 = vmul.f32 %v223_v10, %v211_v9 }
  0x8e   : > { %v227_v12 = vcombine.high %v225_v11, %v225_v11  ;;  %v230_v13 = vsel %vm229_vm0, %v225_v11, 0.0 }
  0x8f   : > { %v231_v14 = vrot.slane %v230_v13, 4 }
  0x90   : > { %v237_v15 = vsel %vm229_vm0, %v227_v12, 0.0 }
  0x91   : > { %v232_v16 = vadd.f32 %v231_v14, %v230_v13  ;;  %v238_v17 = vrot.slane %v237_v15, 4 }
  0x93   : > { %v233_v18 = vrot.slane %v232_v16, 2  ;;  %v239_v19 = vadd.f32 %v238_v17, %v237_v15 }
  0x95   : > { %v234_v20 = vadd.f32 %v233_v18, %v232_v16  ;;  %v240_v21 = vrot.slane %v239_v19, 2 }
  0x97   : > { %v235_v22 = vrot.slane %v234_v20, 1  ;;  %v241_v23 = vadd.f32 %v240_v21, %v239_v19 }
  0x99   : > { %v236_v25 = vadd.f32 %v235_v22, %v234_v20  ;;  %v242_v26 = vrot.slane %v241_v23, 1 }
  0x9b   : > { %v243_v27 = vadd.f32 %v242_v26, %v241_v23  ;;  %v246_v28 = vadd.f32 %v245_v24, %v236_v25 }
  0x9d   : > { %v247_v29 = vadd.f32 %v245_v24, %v243_v27  ;;  %v362_v30 = vmul.f32 -1.442695, %v246_v28 }
  0x9f   : > { %395 = vpow2.f32 %v362_v30  ;;  %v363_v31 = vmul.f32 -1.442695, %v247_v29 }
  0xa1   : > { %397 = vpow2.f32 %v363_v31 }
  0xac   : > { %v396_v32 = vpop.eup %395 }
  0xad   : > { %v254_v33 = vadd.f32 1.0, %v396_v32 }
  0xae   : > { %v398_v34 = vpop.eup %397 }
  0xaf   : > { %v255_v35 = vadd.f32 1.0, %v398_v34  ;;  %399 = vrcp.f32 %v254_v33 }
  0xb1   : > { %401 = vrcp.f32 %v255_v35 }
  0xbc   : > { %v400_v36 = vpop.eup %399 }
  0xbe   : > { %v402_v37 = vpop.eup %401 }
  0xbf   : > { %v262_v38 = vcombine.low %v400_v36, %v402_v37 }
  0xc1   : > { %v264_v39 = vmul.f32 %v262_v38, %v211_v9 }
  0xc3   : > { %265 = vst [vmem:[%s209_s26] sm:$0xff] %v264_v39 }
  0xc4 PF: > { %s14_s16 = sadd.s32 1, %s425_s16   ;;  %s499_s14 = smov %s421_s15 }
  0xc5   : > { %p11_p5 = scmp.ge.s32.totalorder %s14_s16, 4   ;;  %s500_s15 = smov %s502_s2 }
  0xc7   :  { %13 = sbr.rel (!%p11_p5) target bundleno = 2 (0x2), region = 62 }

</bundles_post_ra>
